<compile_context>
chip_gen: v7x
topology: tpu7x:2x2x1
jax: 0.10.0
libtpu: 0.0.40
codegen_flags: <defaults>
</compile_context>

<pallas_src>
import functools

import jax
import jax.numpy as jnp
from jax.experimental import pallas as pl
from jax.experimental.pallas import tpu as pltpu


def _all_in_one_kernel(x_ref, w1_ref, b1_ref, ws_ref, bs_ref, wt_ref, bt_ref,
                       sel_ref, pt1_ref, pt2_ref, bias_ref,
                       y_ref, jac_ref, *, clamp, subtile, n_sub):
    """One (sample-block, pixel-tile) grid step.

    x_ref block is (1, R, TILE) f32 with R = bpb*C packed-sample channels on the
    sublane axis and TILE pixels on the lane axis.  All channel mixing is done
    with small block-diagonal matrices, so there is no sublane slicing in-kernel.
    """
    w1 = w1_ref[...]; b1 = b1_ref[...]
    ws = ws_ref[...]; bs = bs_ref[...]
    wt = wt_ref[...]; bt = bt_ref[...]
    sel = sel_ref[...]
    pt1 = pt1_ref[...]; pt2 = pt2_ref[...]; bias = bias_ref[...]

    rowsum = jnp.zeros((jac_ref.shape[2], 1), jnp.float32)

    # Static sub-chunk loop over the lane axis: the DMA tile can be large while
    # the per-chunk intermediates (h is (bpb*hidden, subtile)) stay ~<=32 vregs.
    for j in range(n_sub):
        lo, hi = j * subtile, (j + 1) * subtile
        x = x_ref[0, :, lo:hi]                                       # (R, subtile)

        # subnet: per-pixel MLP (1x1 conv -> ReLU -> 1x1 conv), block-diag over samples
        h = jnp.maximum(
            jnp.dot(w1, x, preferred_element_type=jnp.float32) + b1, 0.0)
        s_raw = jnp.dot(ws, h, preferred_element_type=jnp.float32) + bs
        t_raw = jnp.dot(wt, h, preferred_element_type=jnp.float32) + bt

        # affine coupling: log_e(s) = clamp * tanh(0.1 * s)
        sub_jac = clamp * jnp.tanh(0.1 * s_raw)                      # (R2, subtile)
        x2 = jnp.dot(sel, x, preferred_element_type=jnp.float32)     # x2 rows per sample
        x2_new = x2 * jnp.exp(sub_jac) + 0.1 * t_raw

        # global affine (softplus scale + offset) + hard permutation, folded
        # into PT1/PT2/bias in the wrapper (no concat, no per-tile softplus).
        # TODO(synk): for large C a channel-gather would beat the PT matmuls.
        y = (jnp.dot(pt1, x, preferred_element_type=jnp.float32)
             + jnp.dot(pt2, x2_new, preferred_element_type=jnp.float32)
             + bias)                                                 # (R, subtile)
        y_ref[0, :, lo:hi] = y.astype(y_ref.dtype)

        rowsum = rowsum + jnp.sum(sub_jac, axis=1, keepdims=True)

    # Tiny per-tile Jacobian partial (per packed-sample x2-channel row);
    # cross-tile / cross-channel reduction happens in the wrapper, so both
    # grid axes stay "parallel".
    jac_ref[0, 0] = rowsum


def _round_up(a, b):
    return ((a + b - 1) // b) * b


def _largest_divisor(total, unit, cap):
    """Largest multiple of `unit` that divides `total`, bounded by `cap`."""
    best = unit
    d = unit
    lim = min(cap, total)
    while d <= lim:
        if total % d == 0:
            best = d
        d += unit
    return best


def _pick_batch_pack(n, c):
    """Smallest divisor d of n with d*c >= 8 (fills the 8-sublane layout)."""
    best = 1
    for d in range(1, min(n, 8) + 1):
        if n % d == 0:
            best = d
            if d * c >= 8:
                break
    return best


def all_in_one_block_forward(x_nchw, params, clamp=2.0, max_tile=2048):
    N, C, H, W = x_nchw.shape
    c1 = C - C // 2
    c2 = C // 2
    hw = H * W
    hidden = params["w1"].shape[1]

    # ---- pack bpb batch samples onto the sublane axis (fix C<8 underfill) ----
    bpb = _pick_batch_pack(N, C)
    nb = N // bpb
    r = bpb * C                     # channel rows per block
    r2 = bpb * c2

    # ---- pixel-tile selection: tile divides the 128-rounded pixel count so the
    #      common case has no pad/slice HBM round trip; VMEM-budget aware cap
    #      (conservative for v7x: 64 MiB physical / 32 MiB scoped default). ----
    hw_pad = _round_up(hw, 128)
    subtile = _largest_divisor(hw_pad, 128, 512)
    vmem_budget = 12 * 1024 * 1024
    tile_cap = max(subtile, min(max_tile, vmem_budget // (16 * r * 4)))
    tile = _largest_divisor(hw_pad, subtile, tile_cap)
    n_sub = tile // subtile
    n_tiles = hw_pad // tile

    # NCHW -> (nb, bpb*C, H*W): pure reshape, no data movement.
    x = x_nchw.reshape(nb, r, hw)
    if hw_pad != hw:                 # rare fallback: hw not a multiple of 128
        x = jnp.pad(x, ((0, 0), (0, 0), (0, hw_pad - hw)))

    # ---- fold global affine (softplus scale + offset) + hard permutation ----
    gs = params["global_scale"]                          # (1, C)
    scale = 0.2 * jax.nn.softplus(0.5 * gs)              # 0.1 * softplus(beta=0.5)
    offset = params["global_offset"]                     # (1, C)
    perm_wt = params["perm_wt"]                          # (C, C): y_row = x_row @ perm_wt
    pt = (scale.reshape(C, 1) * perm_wt).T               # (C_out, C_in)
    pt1 = pt[:, :c1]
    pt2 = pt[:, c1:]
    bias_col = (offset @ perm_wt).reshape(C, 1)
    log_term = hw * jnp.sum(jnp.log(scale + 1e-12))      # loop-invariant jac term

    # ---- block-diagonal (over packed samples) weights; tiny O((bpb*C)^2) ----
    eye = jnp.eye(bpb, dtype=jnp.float32)
    w1t = params["w1"].T                                 # (hidden, c1)
    w2t = params["w2"].T                                 # (2*c2, hidden)
    w1b = jnp.kron(eye, jnp.concatenate(
        [w1t, jnp.zeros((hidden, c2), jnp.float32)], axis=1))          # (bpb*hidden, r)
    b1b = jnp.tile(params["b1"].reshape(hidden, 1), (bpb, 1))
    wsb = jnp.kron(eye, w2t[:c2])                                       # (r2, bpb*hidden)
    wtb = jnp.kron(eye, w2t[c2:])
    bsb = jnp.tile(params["b2"][:, :c2].reshape(c2, 1), (bpb, 1))
    btb = jnp.tile(params["b2"][:, c2:].reshape(c2, 1), (bpb, 1))
    selb = jnp.kron(eye, jnp.concatenate(
        [jnp.zeros((c2, c1), jnp.float32), jnp.eye(c2, dtype=jnp.float32)], axis=1))
    pt1b = jnp.kron(eye, jnp.concatenate(
        [pt1, jnp.zeros((C, c2), jnp.float32)], axis=1))                # (r, r)
    pt2b = jnp.kron(eye, pt2)                                           # (r, r2)
    biasb = jnp.tile(bias_col, (bpb, 1))                                # (r, 1)

    consts = (w1b, b1b, wsb, bsb, wtb, btb, selb, pt1b, pt2b, biasb)

    kernel = functools.partial(_all_in_one_kernel, clamp=clamp,
                               subtile=subtile, n_sub=n_sub)

    def const_spec(arr):
        return pl.BlockSpec(arr.shape, lambda n, t: (0, 0))

    flops = 2 * N * hw_pad * (c1 * hidden + 2 * c2 * hidden + c2 * C + C * C + C * c2)
    transcendentals = 2 * N * hw_pad * c2
    bytes_accessed = 4 * (2 * nb * r * hw_pad + nb * n_tiles * r2)

    y_blocks, jac_part = pl.pallas_call(
        kernel,
        out_shape=(jax.ShapeDtypeStruct((nb, r, hw_pad), x.dtype),
                   jax.ShapeDtypeStruct((nb, n_tiles, r2, 1), jnp.float32)),
        grid=(nb, n_tiles),
        in_specs=[pl.BlockSpec((1, r, tile), lambda n, t: (n, 0, t))]
                 + [const_spec(a) for a in consts],
        out_specs=(pl.BlockSpec((1, r, tile), lambda n, t: (n, 0, t)),
                   pl.BlockSpec((1, 1, r2, 1), lambda n, t: (n, t, 0, 0))),
        compiler_params=pltpu.CompilerParams(
            dimension_semantics=("parallel", "parallel"),
            vmem_limit_bytes=32 * 1024 * 1024),
        cost_estimate=pl.CostEstimate(flops=flops,
                                      transcendentals=transcendentals,
                                      bytes_accessed=bytes_accessed),
    )(x, *consts)

    # ---- tiny wrapper-side reductions ----
    if hw_pad != hw:
        y_blocks = y_blocks[:, :, :hw]
    y = y_blocks.reshape(N, C, H, W)

    jac_rows = jac_part.sum(axis=1)                                    # (nb, r2, 1)
    jac_raw = jac_rows.reshape(nb, bpb, c2).sum(axis=-1).reshape(N)
    if hw_pad != hw:
        # padded pixel columns have x1 = x2 = 0 -> their sub_jac is the same
        # constant for every padded pixel; subtract it in closed form instead
        # of masking in-kernel.
        h0 = jnp.maximum(params["b1"], 0.0)                            # (1, hidden)
        a0 = h0 @ params["w2"] + params["b2"]                          # (1, 2*c2)
        sj0 = clamp * jnp.tanh(0.1 * a0[:, :c2])
        jac_raw = jac_raw - (hw_pad - hw) * jnp.sum(sj0)
    jac = jac_raw + log_term
    return y, jac


def init_params(key, C, hidden=32):
    """Deterministic parameter init mirroring AllInOneBlock.__init__ shapes."""
    c1 = C - C // 2
    c2 = C // 2
    k1, k2, k3, k4, kp = jax.random.split(key, 5)
    w1 = 0.3 * jax.random.normal(k1, (c1, hidden), jnp.float32)
    b1 = 0.1 * jax.random.normal(k2, (1, hidden), jnp.float32)
    w2 = 0.3 * jax.random.normal(k3, (hidden, 2 * c2), jnp.float32)
    b2 = 0.1 * jax.random.normal(k4, (1, 2 * c2), jnp.float32)
    # hard permutation matrix: w[i, perm[i]] = 1  (permute_soft=False branch)
    perm = jax.random.permutation(kp, C)
    w = jnp.zeros((C, C), jnp.float32).at[jnp.arange(C), perm].set(1.0)
    return dict(
        w1=w1, b1=b1, w2=w2, b2=b2,
        # SOFTPLUS type, global_affine_init=1.0 -> global_scale = 10.0
        global_scale=jnp.full((1, C), 10.0, jnp.float32),
        global_offset=jnp.zeros((1, C), jnp.float32),
        perm_wt=w.T,   # conv2d(x, w[:, :, None, None]) == x_pixels @ w.T
    )


def reference_forward(x, params, clamp=2.0):
    """Pure-JAX reference replicating the PyTorch forward (rev=False)."""
    N, C, H, W = x.shape
    c1 = C - C // 2
    c2 = C // 2
    x1, x2 = x[:, :c1], x[:, c1:]
    xf = jnp.transpose(x1, (0, 2, 3, 1))
    h = jnp.maximum(xf @ params["w1"] + params["b1"], 0.0)
    a = h @ params["w2"] + params["b2"]
    a = jnp.transpose(a, (0, 3, 1, 2))               # (N, 2*c2, H, W)
    sub_jac = clamp * jnp.tanh(0.1 * a[:, :c2])
    x2n = x2 * jnp.exp(sub_jac) + 0.1 * a[:, c2:]
    j2 = jnp.sum(sub_jac, axis=(1, 2, 3))
    x_out = jnp.concatenate([x1, x2n], axis=1)
    scale = 0.2 * jax.nn.softplus(0.5 * params["global_scale"])   # (1, C)
    jac = j2 + H * W * jnp.sum(jnp.log(scale + 1e-12))
    xo = x_out * scale.reshape(1, C, 1, 1) + params["global_offset"].reshape(1, C, 1, 1)
    y = jnp.einsum('nchw,cd->ndhw', xo, params["perm_wt"])
    return y, jac


if __name__ == "__main__":
    key = jax.random.PRNGKey(0)
    kx, kp = jax.random.split(key)
    N, C, H, W = 2, 4, 16, 16
    x = jax.random.normal(kx, (N, C, H, W), jnp.float32)
    params = init_params(kp, C, hidden=32)

    y, jac = all_in_one_block_forward(x, params)
    jax.block_until_ready((y, jac))

    y_ref, jac_ref = reference_forward(x, params)
    assert jnp.allclose(y, y_ref, atol=1e-3, rtol=1e-3), "output mismatch"
    assert jnp.allclose(jac, jac_ref, atol=1e-3, rtol=1e-3), "jacobian mismatch"

    # TODO(synk): non-default config branches (conditional input, GIN, learned
    # householder permutation, permute_soft, rev=True / reverse_permutation)
    # are not exercised by the default forward and are not implemented.
    print("KERNEL_OK")
</pallas_src>

<mosaic_0001>
module attributes {stable_mosaic.version = 11 : i64} {
  func.func @_all_in_one_kernel(%arg0: i32, %arg1: i32, %arg2: memref<1x8x256xf32, #tpu.memory_space<vmem>>, %arg3: memref<64x8xf32, #tpu.memory_space<vmem>>, %arg4: memref<64x1xf32, #tpu.memory_space<vmem>>, %arg5: memref<4x64xf32, #tpu.memory_space<vmem>>, %arg6: memref<4x1xf32, #tpu.memory_space<vmem>>, %arg7: memref<4x64xf32, #tpu.memory_space<vmem>>, %arg8: memref<4x1xf32, #tpu.memory_space<vmem>>, %arg9: memref<4x8xf32, #tpu.memory_space<vmem>>, %arg10: memref<8x8xf32, #tpu.memory_space<vmem>>, %arg11: memref<8x4xf32, #tpu.memory_space<vmem>>, %arg12: memref<8x1xf32, #tpu.memory_space<vmem>>, %arg13: memref<1x8x256xf32, #tpu.memory_space<vmem>>, %arg14: memref<1x1x4x1xf32, #tpu.memory_space<vmem>>) attributes {dimension_semantics = [#tpu.dimension_semantics<parallel>, #tpu.dimension_semantics<parallel>], iteration_bounds = array<i64: 1, 1>, scalar_prefetch = 0 : i64, scratch_operands = 0 : i64, tpu.core_type = #tpu.core_type<tc>, window_params = [{transform_indices = @transform_0, window_bounds = array<i64: 1, 8, 256>}, {pipeline_mode = #tpu.pipeline_mode<synchronous>, transform_indices = @transform_1, window_bounds = array<i64: 64, 8>}, {pipeline_mode = #tpu.pipeline_mode<synchronous>, transform_indices = @transform_2, window_bounds = array<i64: 64, 1>}, {pipeline_mode = #tpu.pipeline_mode<synchronous>, transform_indices = @transform_3, window_bounds = array<i64: 4, 64>}, {pipeline_mode = #tpu.pipeline_mode<synchronous>, transform_indices = @transform_4, window_bounds = array<i64: 4, 1>}, {pipeline_mode = #tpu.pipeline_mode<synchronous>, transform_indices = @transform_5, window_bounds = array<i64: 4, 64>}, {pipeline_mode = #tpu.pipeline_mode<synchronous>, transform_indices = @transform_6, window_bounds = array<i64: 4, 1>}, {pipeline_mode = #tpu.pipeline_mode<synchronous>, transform_indices = @transform_7, window_bounds = array<i64: 4, 8>}, {pipeline_mode = #tpu.pipeline_mode<synchronous>, transform_indices = @transform_8, window_bounds = array<i64: 8, 8>}, {pipeline_mode = #tpu.pipeline_mode<synchronous>, transform_indices = @transform_9, window_bounds = array<i64: 8, 4>}, {pipeline_mode = #tpu.pipeline_mode<synchronous>, transform_indices = @transform_10, window_bounds = array<i64: 8, 1>}, {transform_indices = @transform_11, window_bounds = array<i64: 1, 8, 256>}, {transform_indices = @transform_12, window_bounds = array<i64: 1, 1, 4, 1>}]} {
    %c0 = arith.constant 0 : index
    %c0_0 = arith.constant 0 : index
    %0 = vector.load %arg3[%c0, %c0_0] : memref<64x8xf32, #tpu.memory_space<vmem>>, vector<64x8xf32>
    %c0_1 = arith.constant 0 : index
    %c0_2 = arith.constant 0 : index
    %1 = vector.load %arg4[%c0_1, %c0_2] : memref<64x1xf32, #tpu.memory_space<vmem>>, vector<64x1xf32>
    %c0_3 = arith.constant 0 : index
    %c0_4 = arith.constant 0 : index
    %2 = vector.load %arg5[%c0_3, %c0_4] : memref<4x64xf32, #tpu.memory_space<vmem>>, vector<4x64xf32>
    %c0_5 = arith.constant 0 : index
    %c0_6 = arith.constant 0 : index
    %3 = vector.load %arg6[%c0_5, %c0_6] : memref<4x1xf32, #tpu.memory_space<vmem>>, vector<4x1xf32>
    %c0_7 = arith.constant 0 : index
    %c0_8 = arith.constant 0 : index
    %4 = vector.load %arg7[%c0_7, %c0_8] : memref<4x64xf32, #tpu.memory_space<vmem>>, vector<4x64xf32>
    %c0_9 = arith.constant 0 : index
    %c0_10 = arith.constant 0 : index
    %5 = vector.load %arg8[%c0_9, %c0_10] : memref<4x1xf32, #tpu.memory_space<vmem>>, vector<4x1xf32>
    %c0_11 = arith.constant 0 : index
    %c0_12 = arith.constant 0 : index
    %6 = vector.load %arg9[%c0_11, %c0_12] : memref<4x8xf32, #tpu.memory_space<vmem>>, vector<4x8xf32>
    %c0_13 = arith.constant 0 : index
    %c0_14 = arith.constant 0 : index
    %7 = vector.load %arg10[%c0_13, %c0_14] : memref<8x8xf32, #tpu.memory_space<vmem>>, vector<8x8xf32>
    %c0_15 = arith.constant 0 : index
    %c0_16 = arith.constant 0 : index
    %8 = vector.load %arg11[%c0_15, %c0_16] : memref<8x4xf32, #tpu.memory_space<vmem>>, vector<8x4xf32>
    %c0_17 = arith.constant 0 : index
    %c0_18 = arith.constant 0 : index
    %9 = vector.load %arg12[%c0_17, %c0_18] : memref<8x1xf32, #tpu.memory_space<vmem>>, vector<8x1xf32>
    %cst = arith.constant 0.000000e+00 : f32
    %10 = vector.broadcast %cst : f32 to vector<4x1xf32>
    %c0_19 = arith.constant 0 : index
    %c0_20 = arith.constant 0 : index
    %c0_21 = arith.constant 0 : index
    %11 = vector.load %arg2[%c0_19, %c0_20, %c0_21] : memref<1x8x256xf32, #tpu.memory_space<vmem>>, vector<1x8x256xf32>
    %12 = vector.shape_cast %11 : vector<1x8x256xf32> to vector<8x256xf32>
    %cst_22 = arith.constant dense<0.000000e+00> : vector<64x256xf32>
    %13 = tpu.matmul %0, %12, %cst_22 {dimension_numbers = #tpu.dot_dimension_numbers<[1], [0], [0], [1], [0, 0, 1, 1], [], []>} : vector<64x8xf32>, vector<8x256xf32>, vector<64x256xf32> -> vector<64x256xf32>
    %14 = vector.broadcast %1 : vector<64x1xf32> to vector<64x256xf32>
    %15 = arith.addf %13, %14 : vector<64x256xf32>
    %cst_23 = arith.constant 0.000000e+00 : f32
    %16 = vector.broadcast %cst_23 : f32 to vector<64x256xf32>
    %17 = arith.maximumf %15, %16 : vector<64x256xf32>
    %cst_24 = arith.constant dense<0.000000e+00> : vector<4x256xf32>
    %18 = tpu.matmul %2, %17, %cst_24 {dimension_numbers = #tpu.dot_dimension_numbers<[1], [0], [0], [1], [0, 0, 1, 1], [], []>} : vector<4x64xf32>, vector<64x256xf32>, vector<4x256xf32> -> vector<4x256xf32>
    %19 = vector.broadcast %3 : vector<4x1xf32> to vector<4x256xf32>
    %20 = arith.addf %18, %19 : vector<4x256xf32>
    %cst_25 = arith.constant dense<0.000000e+00> : vector<4x256xf32>
    %21 = tpu.matmul %4, %17, %cst_25 {dimension_numbers = #tpu.dot_dimension_numbers<[1], [0], [0], [1], [0, 0, 1, 1], [], []>} : vector<4x64xf32>, vector<64x256xf32>, vector<4x256xf32> -> vector<4x256xf32>
    %22 = vector.broadcast %5 : vector<4x1xf32> to vector<4x256xf32>
    %23 = arith.addf %21, %22 : vector<4x256xf32>
    %cst_26 = arith.constant 1.000000e-01 : f32
    %24 = vector.broadcast %cst_26 : f32 to vector<4x256xf32>
    %25 = arith.mulf %24, %20 : vector<4x256xf32>
    %26 = math.tanh %25 : vector<4x256xf32>
    %cst_27 = arith.constant 2.000000e+00 : f32
    %27 = vector.broadcast %cst_27 : f32 to vector<4x256xf32>
    %28 = arith.mulf %27, %26 : vector<4x256xf32>
    %cst_28 = arith.constant dense<0.000000e+00> : vector<4x256xf32>
    %29 = tpu.matmul %6, %12, %cst_28 {dimension_numbers = #tpu.dot_dimension_numbers<[1], [0], [0], [1], [0, 0, 1, 1], [], []>} : vector<4x8xf32>, vector<8x256xf32>, vector<4x256xf32> -> vector<4x256xf32>
    %30 = math.exp %28 : vector<4x256xf32>
    %31 = arith.mulf %29, %30 : vector<4x256xf32>
    %cst_29 = arith.constant 1.000000e-01 : f32
    %32 = vector.broadcast %cst_29 : f32 to vector<4x256xf32>
    %33 = arith.mulf %32, %23 : vector<4x256xf32>
    %34 = arith.addf %31, %33 : vector<4x256xf32>
    %cst_30 = arith.constant dense<0.000000e+00> : vector<8x256xf32>
    %35 = tpu.matmul %7, %12, %cst_30 {dimension_numbers = #tpu.dot_dimension_numbers<[1], [0], [0], [1], [0, 0, 1, 1], [], []>} : vector<8x8xf32>, vector<8x256xf32>, vector<8x256xf32> -> vector<8x256xf32>
    %cst_31 = arith.constant dense<0.000000e+00> : vector<8x256xf32>
    %36 = tpu.matmul %8, %34, %cst_31 {dimension_numbers = #tpu.dot_dimension_numbers<[1], [0], [0], [1], [0, 0, 1, 1], [], []>} : vector<8x4xf32>, vector<4x256xf32>, vector<8x256xf32> -> vector<8x256xf32>
    %37 = arith.addf %35, %36 : vector<8x256xf32>
    %38 = vector.broadcast %9 : vector<8x1xf32> to vector<8x256xf32>
    %39 = arith.addf %37, %38 : vector<8x256xf32>
    %c0_32 = arith.constant 0 : index
    %c0_33 = arith.constant 0 : index
    %c0_34 = arith.constant 0 : index
    %40 = vector.load %arg13[%c0_32, %c0_33, %c0_34] : memref<1x8x256xf32, #tpu.memory_space<vmem>>, vector<1x8x256xf32>
    %41 = vector.shape_cast %40 : vector<1x8x256xf32> to vector<8x256xf32>
    %42 = vector.shape_cast %39 : vector<8x256xf32> to vector<1x8x256xf32>
    tpu.vector_store %arg13[%c0_32, %c0_33, %c0_34], %42 {strides = array<i32>} : memref<1x8x256xf32, #tpu.memory_space<vmem>>, vector<1x8x256xf32>,
    %cst_35 = arith.constant dense<0.000000e+00> : vector<4xf32>
    %43 = vector.multi_reduction <add>, %28, %cst_35 [1] : vector<4x256xf32> to vector<4xf32>
    %44 = vector.shape_cast %43 : vector<4xf32> to vector<4x1xf32>
    %45 = arith.addf %10, %44 : vector<4x1xf32>
    %c0_36 = arith.constant 0 : index
    %c0_37 = arith.constant 0 : index
    %c0_38 = arith.constant 0 : index
    %c0_39 = arith.constant 0 : index
    %46 = vector.load %arg14[%c0_36, %c0_37, %c0_38, %c0_39] : memref<1x1x4x1xf32, #tpu.memory_space<vmem>>, vector<1x1x4x1xf32>
    %47 = vector.shape_cast %46 : vector<1x1x4x1xf32> to vector<4x1xf32>
    %48 = vector.shape_cast %45 : vector<4x1xf32> to vector<1x1x4x1xf32>
    tpu.vector_store %arg14[%c0_36, %c0_37, %c0_38, %c0_39], %48 {strides = array<i32>} : memref<1x1x4x1xf32, #tpu.memory_space<vmem>>, vector<1x1x4x1xf32>,
    return
  }
  func.func @transform_0(%arg0: i32, %arg1: i32) -> (i32, i32, i32) {
    %c0_i32 = arith.constant 0 : i32
    %c0_i32_0 = arith.constant 0 : i32
    return %arg0, %c0_i32, %arg1 : i32, i32, i32
  }
  func.func @transform_1(%arg0: i32, %arg1: i32) -> (i32, i32) {
    %c0_i32 = arith.constant 0 : i32
    %c0_i32_0 = arith.constant 0 : i32
    %c0_i32_1 = arith.constant 0 : i32
    return %c0_i32, %c0_i32_0 : i32, i32
  }
  func.func @transform_2(%arg0: i32, %arg1: i32) -> (i32, i32) {
    %c0_i32 = arith.constant 0 : i32
    %c0_i32_0 = arith.constant 0 : i32
    %c0_i32_1 = arith.constant 0 : i32
    return %c0_i32, %c0_i32_0 : i32, i32
  }
  func.func @transform_3(%arg0: i32, %arg1: i32) -> (i32, i32) {
    %c0_i32 = arith.constant 0 : i32
    %c0_i32_0 = arith.constant 0 : i32
    %c0_i32_1 = arith.constant 0 : i32
    return %c0_i32, %c0_i32_0 : i32, i32
  }
  func.func @transform_4(%arg0: i32, %arg1: i32) -> (i32, i32) {
    %c0_i32 = arith.constant 0 : i32
    %c0_i32_0 = arith.constant 0 : i32
    %c0_i32_1 = arith.constant 0 : i32
    return %c0_i32, %c0_i32_0 : i32, i32
  }
  func.func @transform_5(%arg0: i32, %arg1: i32) -> (i32, i32) {
    %c0_i32 = arith.constant 0 : i32
    %c0_i32_0 = arith.constant 0 : i32
    %c0_i32_1 = arith.constant 0 : i32
    return %c0_i32, %c0_i32_0 : i32, i32
  }
  func.func @transform_6(%arg0: i32, %arg1: i32) -> (i32, i32) {
    %c0_i32 = arith.constant 0 : i32
    %c0_i32_0 = arith.constant 0 : i32
    %c0_i32_1 = arith.constant 0 : i32
    return %c0_i32, %c0_i32_0 : i32, i32
  }
  func.func @transform_7(%arg0: i32, %arg1: i32) -> (i32, i32) {
    %c0_i32 = arith.constant 0 : i32
    %c0_i32_0 = arith.constant 0 : i32
    %c0_i32_1 = arith.constant 0 : i32
    return %c0_i32, %c0_i32_0 : i32, i32
  }
  func.func @transform_8(%arg0: i32, %arg1: i32) -> (i32, i32) {
    %c0_i32 = arith.constant 0 : i32
    %c0_i32_0 = arith.constant 0 : i32
    %c0_i32_1 = arith.constant 0 : i32
    return %c0_i32, %c0_i32_0 : i32, i32
  }
  func.func @transform_9(%arg0: i32, %arg1: i32) -> (i32, i32) {
    %c0_i32 = arith.constant 0 : i32
    %c0_i32_0 = arith.constant 0 : i32
    %c0_i32_1 = arith.constant 0 : i32
    return %c0_i32, %c0_i32_0 : i32, i32
  }
  func.func @transform_10(%arg0: i32, %arg1: i32) -> (i32, i32) {
    %c0_i32 = arith.constant 0 : i32
    %c0_i32_0 = arith.constant 0 : i32
    %c0_i32_1 = arith.constant 0 : i32
    return %c0_i32, %c0_i32_0 : i32, i32
  }
  func.func @transform_11(%arg0: i32, %arg1: i32) -> (i32, i32, i32) {
    %c0_i32 = arith.constant 0 : i32
    %c0_i32_0 = arith.constant 0 : i32
    return %arg0, %c0_i32, %arg1 : i32, i32, i32
  }
  func.func @transform_12(%arg0: i32, %arg1: i32) -> (i32, i32, i32, i32) {
    %c0_i32 = arith.constant 0 : i32
    %c0_i32_0 = arith.constant 0 : i32
    %c0_i32_1 = arith.constant 0 : i32
    return %arg0, %arg1, %c0_i32, %c0_i32_0 : i32, i32, i32, i32
  }
}

</mosaic_0001>

<bundles_post_ra>
// kernel: tpu_custom_call.1
= control target key start
LH: loop header
LB: loop body
LE: loop exit
PB: predicated region body
PF: predicated region fallthrough
CT: control target
= control target key end

     0   :  { %vm107_vm0 = vcmask 64512   ;;  %v789_v4 = vmov 0.0   ;;  %v790_v9 = vmov 0   ;;  %s989_s0 = inlined_call_operand.vmem [shape: f32[1,8,256], index: 0, kind: input, shape index: {}]   ;;  %s990_s1 = inlined_call_operand.vmem [shape: f32[64,8], index: 1, kind: input, shape index: {}]   ;;  %s991_s2 = inlined_call_operand.vmem [shape: f32[64,1], index: 2, kind: input, shape index: {}]   ;;  %s992_s3 = inlined_call_operand.vmem [shape: f32[4,64], index: 3, kind: input, shape index: {}]   ;;  %s993_s4 = inlined_call_operand.vmem [shape: f32[4,1], index: 4, kind: input, shape index: {}]   ;;  %s994_s5 = inlined_call_operand.vmem [shape: f32[4,64], index: 5, kind: input, shape index: {}]   ;;  %s995_s6 = inlined_call_operand.vmem [shape: f32[4,1], index: 6, kind: input, shape index: {}]   ;;  %s996_s7 = inlined_call_operand.vmem [shape: f32[4,8], index: 7, kind: input, shape index: {}]   ;;  %s997_s8 = inlined_call_operand.vmem [shape: f32[8,8], index: 8, kind: input, shape index: {}]   ;;  %s998_s9 = inlined_call_operand.vmem [shape: f32[8,4], index: 9, kind: input, shape index: {}]   ;;  %s999_s10 = inlined_call_operand.vmem [shape: f32[8,1], index: 10, kind: input, shape index: {}]   ;;  %s1000_s11 = inlined_call_operand.hbm [shape: f32[1,8,256], index: 11, kind: output, shape index: {0}]   ;;  %s1001_s12 = inlined_call_operand.vmem [shape: f32[1,1,4,1], index: 12, kind: output, shape index: {1}]  }
   0x1   :  { %v860_v0 = vld [vmem:[%s989_s0 + $0x8] sm:$0xff]  ;;  %v865_v1 = vld [vmem:[%s989_s0] sm:$0xff]  ;;  %196 = vmatprep.mubr.f32.mxu0 %v789_v4  ;;  %220 = vmatprep.mubr.f32.mxu1 %v789_v4  ;;  %v51_v5 = vld [vmem:[%s991_s2 + $0x10] sm:$0xff] }
   0x2   :  { %132 = vmatprep.subr.mxu0 %v860_v0  ;;  %748 = vmatprep.subr.mxu1 %v860_v0  ;;  %v41_v2 = vld [vmem:[%s990_s1] sm:$0xff]  ;;  %v42_v7 = vld [vmem:[%s990_s1 + $0x8] sm:$0xff] }
   0x3   :  { %v45_v3 = vld [vmem:[%s990_s1 + $0x20] sm:$0xff]  ;;  %133 = vmatpush1.msra.mxu0 %v865_v1  ;;  %749 = vmatpush1.msra.mxu1 %v865_v1  ;;  %v46_v8 = vld [vmem:[%s990_s1 + $0x28] sm:$0xff] }
   0x4   :  { %701 = vmatmul.mubr.msk.f32.vlgmr.msra.gmra.mrb[0].mxu0 %vm107_vm0, %v41_v2  ;;  %705 = vmatmul.mubr.msk.f32.vlgmr.msra.gmra.mrb[0].mxu1 %vm107_vm0, %v45_v3  ;;  %v49_v6 = vld [vmem:[%s991_s2] sm:$0xff] }
   0x5   :  { %202 = vmatprep.mubr.f32.mxu0 %v789_v4  ;;  %226 = vmatprep.mubr.f32.mxu1 %v789_v4 }
   0x6   :  { %756 = vset.pattern.permute.xlu1 %v790_v9  ;;  %755 = vset.pattern.permute.xlu0 %v790_v9 }
   0x7   :  { %79 = vperm.xlu1 %756, %v51_v5   ;;  %69 = vperm.xlu0 %755, %v49_v6  }
   0x8   :  { %18 = vsyncpa [#allocation3], 0  ;;  %702 = vmatmul.mubr.msk.f32.gmra.mrb[2].mxu0 %vm107_vm0, %v42_v7  ;;  %706 = vmatmul.mubr.msk.f32.gmra.mrb[2].mxu1 %vm107_vm0, %v46_v8  ;;  %v52_v10 = vld [vmem:[%s991_s2 + $0x18] sm:$0xff]  ;;  %v50_v11 = vld [vmem:[%s991_s2 + $0x8] sm:$0xff]  ;;  %vm266_vm1 = vcmask 523264   ;;  %vm514_vm2 = vcmask 1043456  }
   0x9   :  { %208 = vmatprep.mubr.f32.mxu0 %v789_v4  ;;  %232 = vmatprep.mubr.f32.mxu1 %v789_v4  ;;  %v43_v12 = vld [vmem:[%s990_s1 + $0x10] sm:$0xff]  ;;  %v54_v14 = vld [vmem:[%s991_s2 + $0x28] sm:$0xff]  ;;  %v53_v15 = vld [vmem:[%s991_s2 + $0x20] sm:$0xff]  ;;  %vm510_vm3 = vcmask 31744   ;;  %vm681_vm4 = vcmask 3072   ;;  %s791_s28 = smov [#allocation2]  }
   0xa   :  { %v47_v13 = vld [vmem:[%s990_s1 + $0x30] sm:$0xff]  ;;  %v44_v16 = vld [vmem:[%s990_s1 + $0x18] sm:$0xff]  ;;  %v60_v20 = vld [vmem:[%s995_s6] sm:$0xf]  ;;  %s689_s0 = sshll.u32 %s791_s28, 4  ;;  %s690_s0 = int_to_ptr.vmem [resolvable:$true] %s689_s0 }
   0xb   :  { %84 = vperm.xlu1 %756, %v52_v10   ;;  %74 = vperm.xlu0 %755, %v50_v11   ;;  %v48_v17 = vld [vmem:[%s990_s1 + $0x38] sm:$0xff]  ;;  %v55_v19 = vld [vmem:[%s991_s2 + $0x30] sm:$0xff]  ;;  %v58_v21 = vld [vmem:[%s993_s4] sm:$0xf]  ;;  %s765_s29 = scalar_lea.vmem %s690_s0, 256  ;;  %p770_p1 = scmp.lt.s32.totalorder %s690_s0, %s690_s0 }
   0xc   :  { %703 = vmatmul.mubr.msk.f32.gmra.mrb[4].mxu0 %vm107_vm0, %v43_v12  ;;  %707 = vmatmul.mubr.msk.f32.gmra.mrb[4].mxu1 %vm107_vm0, %v47_v13  ;;  %v56_v18 = vld [vmem:[%s991_s2 + $0x38] sm:$0xff]  ;;  %v64_v22 = vld [vmem:[%s999_s10] sm:$0xff]  ;;  %p766_p0 = scmp.ne.s32.totalorder %s690_s0, %s765_s29  ;;  %p771_p2 = scmp.lt.s32.totalorder %s765_s29, %s765_s29 }
   0xd   :  { %214 = vmatprep.mubr.f32.mxu0 %v789_v4  ;;  %238 = vmatprep.mubr.f32.mxu1 %v789_v4 }
   0xe   :  { %p772_p3 = por %p771_p2, %p770_p1 }
   0xf   :  { %94 = vperm.xlu1 %756, %v54_v14   ;;  %89 = vperm.xlu0 %755, %v53_v15  }
  0x10   :  { %704 = vmatmul.mubr.msk.f32.gmra.mrb[6].mxu0 %vm107_vm0, %v44_v16  ;;  %708 = vmatmul.mubr.msk.f32.gmra.mrb[6].mxu1 %vm107_vm0, %v48_v17  ;;  %p773_p4 = pnand %p772_p3, %p766_p0 }
  0x11   :  { %334 = vmatprep.mubr.f32.mxu0 %v789_v4  ;;  %413 = vmatprep.mubr.f32.mxu1 %v789_v4 }
  0x13   :  { %104 = vperm.xlu1 %756, %v56_v18   ;;  %99 = vperm.xlu0 %755, %v55_v19  }
  0x17   :  { %343 = vperm.xlu1 %756, %v60_v20   ;;  %263 = vperm.xlu0 %755, %v58_v21  }
  0x1b   :  { %668 = vperm.xlu1 %756, %v64_v22  }
  0x86   :  { %v70_v23 = vpop.permute.xlu0 %69  ;;  %v80_v24 = vpop.permute.xlu1 %79 }
  0x8a   :  { %v75_v25 = vpop.permute.xlu0 %74  ;;  %v85_v26 = vpop.permute.xlu1 %84 }
  0x8e   :  { %v90_v27 = vpop.permute.xlu0 %89  ;;  %v95_v34 = vpop.permute.xlu1 %94 }
  0x92   :  { %v100_v59 = vpop.permute.xlu0 %99  ;;  %v105_v62 = vpop.permute.xlu1 %104 }
  0xd7   :  { %v198_v28 = vpop.f32.mrb[0].mxu0  ;;  %v222_v29 = vpop.f32.mrb[0].mxu1 }
  0xd8   :  { %v200_v30 = vpop.f32.mrb[1].mxu0  ;;  %v223_v31 = vadd.f32 %v222_v29, %v90_v27  ;;  %v224_v32 = vpop.f32.mrb[1].mxu1  ;;  %v199_v35 = vadd.f32 %v198_v28, %v70_v23  ;;  %v61_v28 = vld [vmem:[%s996_s7] sm:$0xf] }
  0xd9   :  { %v225_v33 = vadd.f32 %v224_v32, %v90_v27  ;;  %v201_v36 = vadd.f32 %v200_v30, %v70_v23  ;;  %v59_v27 = vld [vmem:[%s994_s5] sm:$0xf]  ;;  %v264_v29 = vpop.permute.xlu0 %263 }
  0xda   :  { %v253_v39 = vmax.f32 %v223_v31, 0.0  ;;  %v245_v47 = vmax.f32 %v199_v35, 0.0 }
  0xdb   :  { %v204_v37 = vpop.f32.mrb[2].mxu0  ;;  %v228_v38 = vpop.f32.mrb[2].mxu1  ;;  %v254_v44 = vmax.f32 %v225_v33, 0.0  ;;  %v246_v50 = vmax.f32 %v201_v36, 0.0 }
  0xdc   :  { %v205_v40 = vadd.f32 %v204_v37, %v75_v25  ;;  %v229_v41 = vadd.f32 %v228_v38, %v95_v34  ;;  %v206_v42 = vpop.f32.mrb[3].mxu0  ;;  %v230_v43 = vpop.f32.mrb[3].mxu1 }
  0xdd   :  { %v207_v45 = vadd.f32 %v206_v42, %v75_v25  ;;  %v231_v46 = vadd.f32 %v230_v43, %v95_v34 }
  0xde   :  { %v247_v48 = vmax.f32 %v205_v40, 0.0  ;;  %v255_v49 = vmax.f32 %v229_v41, 0.0 }
  0xdf   :  { %v248_v51 = vmax.f32 %v207_v45, 0.0  ;;  %v256_v52 = vmax.f32 %v231_v46, 0.0  ;;  %v210_v53 = vpop.f32.mrb[4].mxu0  ;;  %v234_v54 = vpop.f32.mrb[4].mxu1 }
  0xe0   :  { %v718_v55 = vpack.c.bf16 %v247_v48, %v245_v47  ;;  %v726_v56 = vpack.c.bf16 %v255_v49, %v253_v39  ;;  %v212_v57 = vpop.f32.mrb[5].mxu0  ;;  %v236_v58 = vpop.f32.mrb[5].mxu1  ;;  %v211_v63 = vadd.f32 %v210_v53, %v80_v24  ;;  %v235_v2 = vadd.f32 %v234_v54, %v100_v59 }
  0xe1   :  { %v716_v60 = vpack.c.bf16 %v248_v51, %v246_v50  ;;  %v724_v61 = vpack.c.bf16 %v256_v52, %v254_v44  ;;  %v213_v3 = vadd.f32 %v212_v57, %v80_v24  ;;  %v237_v5 = vadd.f32 %v236_v58, %v100_v59  ;;  %v344_v49 = vpop.permute.xlu1 %343 }
  0xe2   :  { %v249_v14 = vmax.f32 %v211_v63, 0.0  ;;  %v257_v15 = vmax.f32 %v235_v2, 0.0 }
  0xe3   :  { %v216_v6 = vpop.f32.mrb[6].mxu0  ;;  %v240_v7 = vpop.f32.mrb[6].mxu1  ;;  %717 = vmatprep.subr.bf16.mxu0 %v716_v60  ;;  %733 = vmatprep.subr.bf16.mxu1 %v716_v60  ;;  %v250_v18 = vmax.f32 %v213_v3, 0.0  ;;  %v258_v19 = vmax.f32 %v237_v5, 0.0  ;;  %v63_v60 = vld [vmem:[%s998_s9] sm:$0xff] }
  0xe4   :  { %v217_v8 = vadd.f32 %v216_v6, %v85_v26  ;;  %v241_v9 = vadd.f32 %v240_v7, %v105_v62  ;;  %v218_v10 = vpop.f32.mrb[7].mxu0  ;;  %v242_v11 = vpop.f32.mrb[7].mxu1  ;;  %719 = vmatpush1.bf16.msra.mxu0 %v718_v55  ;;  %735 = vmatpush1.bf16.msra.mxu1 %v718_v55 }
  0xe5   :  { %v219_v12 = vadd.f32 %v218_v10, %v85_v26  ;;  %v243_v13 = vadd.f32 %v242_v11, %v105_v62  ;;  %v57_v26 = vld [vmem:[%s992_s3] sm:$0xf]  ;;  %v669_v63 = vpop.permute.xlu1 %668 }
  0xe6   :  { %v251_v16 = vmax.f32 %v217_v8, 0.0  ;;  %v259_v17 = vmax.f32 %v241_v9, 0.0 }
  0xe7   :  { %v252_v20 = vmax.f32 %v219_v12, 0.0  ;;  %v260_v21 = vmax.f32 %v243_v13, 0.0 }
  0xe8   :  { %v722_v22 = vpack.c.bf16 %v251_v16, %v249_v14  ;;  %v730_v23 = vpack.c.bf16 %v259_v17, %v257_v15 }
  0xe9   :  { %v720_v24 = vpack.c.bf16 %v252_v20, %v250_v18  ;;  %v728_v25 = vpack.c.bf16 %v260_v21, %v258_v19 }
  0xeb   :  { %721 = vmatprep.subr.bf16.mxu0 %v720_v24  ;;  %737 = vmatprep.subr.bf16.mxu1 %v720_v24 }
  0xec   :  { %723 = vmatpush1.bf16.msra.mxu0 %v722_v22  ;;  %739 = vmatpush1.bf16.msra.mxu1 %v722_v22 }
  0xed   :  { %725 = vmatprep.subr.bf16.mxu0 %v724_v61  ;;  %741 = vmatprep.subr.bf16.mxu1 %v724_v61  ;;  %v62_v61 = vld [vmem:[%s997_s8] sm:$0xff] }
  0xf0   :  { %727 = vmatpush1.bf16.msra.mxu0 %v726_v56  ;;  %743 = vmatpush1.bf16.msra.mxu1 %v726_v56 }
  0xf1   :  { %729 = vmatprep.subr.bf16.mxu0 %v728_v25  ;;  %745 = vmatprep.subr.bf16.mxu1 %v728_v25 }
  0xf4   :  { %731 = vmatpush1.bf16.msra.mxu0 %v730_v23  ;;  %747 = vmatpush1.bf16.msra.mxu1 %v730_v23 }
  0xf5   :  { %429 = vmatprep.subr.mxu0 %v860_v0 }
  0xf7   :  { %709 = vmatmul.mubr.msk.f32.vlgmr.msra.gmra.mrb[8].mxu0 %vm266_vm1, %v57_v26  ;;  %710 = vmatmul.mubr.msk.f32.vlgmr.msra.gmra.mrb[8].mxu1 %vm266_vm1, %v59_v27 }
  0xf8   :  { %430 = vmatpush1.msra.mxu0 %v865_v1  ;;  %493 = vmatprep.mubr.f32.mxu0 %v789_v4 }
  0xf9   :  { %585 = vmatprep.mubr.f32.mxu1 %v789_v4 }
  0xfb   :  { %711 = vmatmul.mubr.msk.f32.vlgmr.msra.gmra.mrb[10].mxu0 %vm107_vm0, %v61_v28 }
 0x1ca   :  { %v336_v30 = vpop.f32.mrb[8].mxu0  ;;  %v415_v31 = vpop.f32.mrb[8].mxu1 }
 0x1cb   :  { %v337_v32 = vadd.f32 %v336_v30, %v264_v29  ;;  %v338_v33 = vpop.f32.mrb[9].mxu0  ;;  %v417_v34 = vpop.f32.mrb[9].mxu1  ;;  %v416_v50 = vadd.f32 %v415_v31, %v344_v49 }
 0x1cc   :  { %v339_v35 = vadd.f32 %v338_v33, %v264_v29  ;;  %v418_v51 = vadd.f32 %v417_v34, %v344_v49 }
 0x1cd   :  { %v420_v36 = vmul.f32 0.1, %v337_v32  ;;  %v506_v54 = vmul.f32 0.1, %v416_v50 }
 0x1ce   :  { %v421_v37 = vmul.f32 0.1, %v339_v35  ;;  %v495_v38 = vpop.f32.mrb[10].mxu0  ;;  %v507_v56 = vmul.f32 0.1, %v418_v51 }
 0x1cf   :  { %757 = vtanh.f32 %v420_v36  ;;  %v497_v39 = vpop.f32.mrb[11].mxu0 }
 0x1d0   :  { %759 = vtanh.f32 %v421_v37 }
 0x1d9   :  { %v758_v40 = vpop.eup %757 }
 0x1da   :  { %v760_v41 = vpop.eup %759  ;;  %v424_v42 = vmul.f32 2.0, %v758_v40 }
 0x1db   :  { %v425_v43 = vmul.f32 2.0, %v760_v41 }
 0x1dc   :  { %v500_v44 = vmul.f32 1.442695, %v424_v42  ;;  %v675_v45 = vsel %vm514_vm2, %v424_v42, 0.0 }
 0x1dd   :  { %v502_v46 = vmul.f32 1.442695, %v425_v43  ;;  %v676_v47 = vsel %vm514_vm2, %v425_v43, 0.0 }
 0x1de   :  { %761 = vpow2.f32 %v500_v44  ;;  %v677_v48 = vadd.f32 %v676_v47, %v675_v45 }
 0x1df   :  { %763 = vpow2.f32 %v502_v46 }
 0x1e0   :  { %678 = vadd.xlane.f32.xlu0 %v677_v48 }
 0x1e8   :  { %v762_v52 = vpop.eup %761 }
 0x1e9   :  { %v764_v53 = vpop.eup %763  ;;  %v504_v55 = vmul.f32 %v762_v52, %v495_v38 }
 0x1ea   :  { %v505_v57 = vmul.f32 %v764_v53, %v497_v39 }
 0x1eb   :  { %v508_v58 = vadd.f32 %v506_v54, %v504_v55 }
 0x1ec   :  { %v509_v59 = vadd.f32 %v507_v56, %v505_v57 }
 0x1ee   :  { %712 = vmatprep.subr.msk.mxu1 %vm514_vm2, %v509_v59 }
 0x1ef   :  { %713 = vmatpush1.msk.msra.mxu1 %vm514_vm2, %v508_v58 }
 0x1f0   :  { %714 = vmatmul.mubr.msk.f32.vlgmr.msra.gmra.mrb[10].mxu1 %vm510_vm3, %v63_v60  ;;  %595 = vmatprep.subr.mxu1 %v860_v0 }
 0x1f1   :  { %596 = vmatpush1.msra.mxu1 %v865_v1  ;;  %659 = vmatprep.mubr.f32.mxu1 %v789_v4 }
 0x1f8   :  { %715 = vmatmul.mubr.msk.f32.vlgmr.msra.gmra.mrb[10].mxu1 %vm107_vm0, %v62_v61 }
 0x26d   :  { %v679_v62 = vpop.xlane.xlu0 %678 }
 0x26e   :  { %682 = vst.msk [vmem:[%s1001_s12] sm:$0xf] %vm681_vm4, %v679_v62 }
 0x2cb   :  { %v661_v0 = vpop.f32.mrb[10].mxu1 }
 0x2cc   :  { %v671_v2 = vadd.f32 %v669_v63, %v661_v0  ;;  %v663_v1 = vpop.f32.mrb[11].mxu1 }
 0x2cd   :  { %v672_v3 = vadd.f32 %v669_v63, %v663_v1 }
 0x2ce   :  { %673 = vst [vmem:[#allocation2] sm:$0xff] %v671_v2 }
 0x2cf   :  { %674 = vst [vmem:[#allocation2 + $0x8] sm:$0xff] %v672_v3 }
 0x2d0   :  { %776 = shalt.err (!%p773_p4)
}
 0x2d1   :  { %s777_s12 = scalar_lea.hbm %s1000_s11, 256 }
 0x2d2   :  { %p778_p5 = scmp.ne.s32.totalorder %s1000_s11, %s777_s12  ;;  %p781_p6 = scmp.lt.u32.totalorder %s777_s12, %s1000_s11 }
 0x2d4   :  { %p783_p7 = pnand %p781_p6, %p778_p5 }
 0x2d6   :  { %786 = shalt.err (!%p783_p7)
}
 0x2d7   :  { %692 = dma.vmem_to_hbm [thread:$0]  %s690_s0, 256, %s1000_s11, [#allocation3]  }
 0x2d8   :  { %787 = dma.done.wait [#allocation3], 256  }
 0x2d9   :  { %788 = vsyncadd [#allocation3], 4294967040 }
 0x2da   :  { %700 = vsyncpa [#allocation3], 1 }

</bundles_post_ra>
